<compile_context>
chip_gen: v5e
topology: v5e:2x2
jax: 0.10.0
libtpu: 0.0.40
codegen_flags: <defaults>
</compile_context>

<pallas_src>
from functools import partial

import jax
import jax.numpy as jnp
from jax import lax
from jax.experimental import pallas as pl
from jax.experimental.pallas import tpu as pltpu


# ---------------------------------------------------------------------------
# Kernels
# ---------------------------------------------------------------------------

def _aad_tail(h_norm, za, gid, bid, w_attr, b_attr, wh, bh, out_ref, *,
              use_mxu_conv_h, compute_dtype):
    """Shared per-tile epilogue: fused conv1/conv2 matmul and the A/I/M blend.

    h_norm : (c_x, t)    f32   normalized activations
    za     : (attr_c, t) act dtype
    gid/bid: (c_x, 1)    f32   fc1/fc2 outputs for this batch
    w_attr : (2*c_x, attr_c) act dtype ; b_attr: (2*c_x, 1) f32
    wh     : (1, c_x) compute dtype if use_mxu_conv_h else (c_x, 1) f32
    bh     : (1, 1) f32
    """
    c_x = out_ref.shape[1]
    cd = compute_dtype

    # conv1 + conv2 in ONE MXU pass: (2*c_x, attr_c) @ (attr_c, t), f32 acc.
    gab = jnp.dot(w_attr, za, preferred_element_type=jnp.float32) + b_attr
    # NOTE: this split assumes c_x is a multiple of the sublane tile (8 for
    # f32); otherwise Mosaic inserts a relayout copy (correct, just slower).
    gamma_attr = gab[:c_x, :].astype(cd)
    beta_attr = gab[c_x:, :].astype(cd)

    # Elementwise chain in compute_dtype (bf16 on v6e/v7x doubles VALU
    # throughput and halves vreg pressure; use f32 on v5e).
    h_c = h_norm.astype(cd)
    A = gamma_attr * h_c + beta_attr
    I = gid.astype(cd) * h_c + bid.astype(cd)        # (c_x, 1) broadcast over lanes

    if use_mxu_conv_h:
        # c_x -> 1 reduction on the MXU (its slot is nearly idle: only one
        # small-K matmul per tile), freeing VALU/XLU slots.
        m_logit = jnp.dot(wh, h_c, preferred_element_type=jnp.float32) + bh
    else:
        # Small c_x: VPU multiply + sublane reduce beats a width-1 MXU push.
        m_logit = jnp.sum(h_norm * wh, axis=0, keepdims=True) + bh
    M = jax.nn.sigmoid(m_logit).astype(cd)           # sigmoid in f32 (EUP), (1, t)

    # Blend refactored: (1-M)*A + M*I == A + M*(I - A)  (one fewer VALU op).
    out_ref[0] = (A + M * (I - A)).astype(out_ref.dtype)


def aad_fused_kernel(h_ref, za_ref, gid_ref, bid_ref, w_attr_ref, b_attr_ref,
                     wh_ref, bh_ref, out_ref, *, use_mxu_conv_h, compute_dtype):
    """Single-HBM-pass variant: full (c_x, HW) block resident, moments in-kernel."""
    # Two-pass InstanceNorm moments in f32 from the resident block (avoids the
    # E[x^2]-E[x]^2 cancellation hazard and a second HBM sweep over h).
    h32 = h_ref[0].astype(jnp.float32)                   # (c_x, HW)
    mean = jnp.mean(h32, axis=1, keepdims=True)          # (c_x, 1)
    d = h32 - mean
    var = jnp.mean(d * d, axis=1, keepdims=True)
    h_norm = d * lax.rsqrt(var + 1e-5)
    _aad_tail(h_norm, za_ref[0], gid_ref[0], bid_ref[0], w_attr_ref[...],
              b_attr_ref[...], wh_ref[...], bh_ref[...], out_ref,
              use_mxu_conv_h=use_mxu_conv_h, compute_dtype=compute_dtype)


def aad_tiled_kernel(h_ref, za_ref, mean_ref, istd_ref, gid_ref, bid_ref,
                     w_attr_ref, b_attr_ref, wh_ref, bh_ref, out_ref, *,
                     use_mxu_conv_h, compute_dtype):
    """Tiled fallback: HW is tiled; moments precomputed in the wrapper."""
    h_norm = (h_ref[0].astype(jnp.float32) - mean_ref[0]) * istd_ref[0]
    _aad_tail(h_norm, za_ref[0], gid_ref[0], bid_ref[0], w_attr_ref[...],
              b_attr_ref[...], wh_ref[...], bh_ref[...], out_ref,
              use_mxu_conv_h=use_mxu_conv_h, compute_dtype=compute_dtype)


# ---------------------------------------------------------------------------
# Wrapper
# ---------------------------------------------------------------------------

def _vmem_estimate(c_x, attr_c, t, act_bytes, out_bytes, cd_bytes, in_kernel_moments):
    """Rough per-grid-step VMEM footprint (bytes) for a lane tile of width t."""
    db = 2  # BlockSpec pipeline double-buffers every input/output block
    est = db * (c_x + attr_c) * t * act_bytes            # h / z_attr tiles
    est += db * c_x * t * out_bytes                      # output tiles
    est += db * 2 * c_x * attr_c * act_bytes             # fused conv weight (also x2)
    est += 2 * c_x * t * 4                               # f32 gab matmul result
    est += (3 if in_kernel_moments else 2) * c_x * t * 4  # f32 h / h_norm temps
    est += (2 * c_x + 2) * t * cd_bytes                  # A / I / gamma/beta temps
    return est


def aad_layer_pallas(h_in, z_attr, z_id, params, *,
                     act_dtype=jnp.bfloat16,       # HBM storage dtype for h / z_attr / weight
                     compute_dtype=jnp.bfloat16,   # elementwise vreg dtype (use f32 on v5e)
                     out_dtype=None,               # None -> h_in.dtype; bf16 halves output stores
                     force_tiled=False,            # testing hook: force the tiled fallback
                     max_hw_tile=None):            # testing hook: cap the lane tile
    """h_in: (N, c_x, H, W), z_attr: (N, attr_c, H, W), z_id: (N, c_id) -> NCHW out."""
    N, c_x, H, W = h_in.shape
    attr_c = z_attr.shape[1]
    HW = H * W
    f32 = jnp.float32
    if out_dtype is None:
        out_dtype = h_in.dtype

    w1, b1, w2, b2, wf1, bf1, wf2, bf2, wh, bh = params

    # (N, C, HW) layout: pure reshapes of NCHW. Cast activations to act_dtype
    # (bf16) at the HBM boundary: the kernel is HBM-bandwidth-bound on
    # v5e/v6e, so this roughly halves the dominant traffic.
    h3 = h_in.reshape(N, c_x, HW).astype(act_dtype)
    za3 = z_attr.reshape(N, attr_c, HW).astype(act_dtype)

    # fc1 / fc2 hoisted out of the kernel (tiny (N, c_id) @ (c_id, c_x) matmuls).
    gamma_id = (z_id.astype(f32) @ wf1.astype(f32) + bf1.astype(f32))[..., None]  # (N, c_x, 1)
    beta_id = (z_id.astype(f32) @ wf2.astype(f32) + bf2.astype(f32))[..., None]

    # conv1 / conv2 fused into one (2*c_x, attr_c) weight -> single MXU pass.
    # Weight stored in act_dtype (bf16) to halve its (double-buffered) VMEM
    # footprint — matters on v7x's 64 MiB VMEM.
    # TODO(synk): single-buffer the constant weight/bias blocks once
    # pipeline_mode=pl.Buffered(1) is validated on the grid-based pipeline.
    w_attr = jnp.concatenate([w1.T, w2.T], axis=0).astype(act_dtype)   # (2*c_x, attr_c)
    b_attr = jnp.concatenate([b1, b2], axis=1).reshape(2 * c_x, 1).astype(f32)
    bh_sc = bh.reshape(1, 1).astype(f32)

    use_mxu_conv_h = c_x >= 64
    if use_mxu_conv_h:
        wh_arg = wh.reshape(1, c_x).astype(compute_dtype)
        wh_spec = pl.BlockSpec((1, c_x), lambda *_: (0, 0))
    else:
        wh_arg = wh.reshape(c_x, 1).astype(f32)
        wh_spec = pl.BlockSpec((c_x, 1), lambda *_: (0, 0))

    # --- VMEM budget, derived per-chip (v7x: 64 MiB; v5e/v6e: 128 MiB). -----
    try:
        vmem_cap = int(pltpu.get_tpu_info().vmem_capacity_bytes)
    except Exception:
        vmem_cap = 64 << 20          # conservative: v7x per-TensorCore VMEM
    vmem_limit = min(vmem_cap * 3 // 4, 96 << 20)
    budget = int(vmem_limit * 0.75)  # headroom for vregs / compiler scratch

    act_bytes = jnp.dtype(act_dtype).itemsize
    out_bytes = jnp.dtype(out_dtype).itemsize
    cd_bytes = jnp.dtype(compute_dtype).itemsize

    # Cost hint so XLA schedules the hoisted fc1/fc2 (and fallback moments)
    # around the custom call instead of serializing.
    cost = pl.CostEstimate(
        flops=int(N * HW * (4 * c_x * attr_c + 2 * c_x + 10 * c_x)),
        transcendentals=int(N * HW),
        bytes_accessed=int(N * HW * ((c_x + attr_c) * act_bytes + c_x * out_bytes)
                           + 2 * c_x * attr_c * act_bytes + N * c_x * 4 * 4),
    )

    fits_fused = _vmem_estimate(c_x, attr_c, HW, act_bytes, out_bytes,
                                cd_bytes, True) <= budget
    use_fused = fits_fused and not force_tiled

    if use_fused:
        # ---- Single-HBM-pass path: grid over batch only, moments in-kernel.
        kernel = partial(aad_fused_kernel, use_mxu_conv_h=use_mxu_conv_h,
                         compute_dtype=compute_dtype)
        out3 = pl.pallas_call(
            kernel,
            out_shape=jax.ShapeDtypeStruct((N, c_x, HW), out_dtype),
            grid=(N,),
            in_specs=[
                pl.BlockSpec((1, c_x, HW), lambda b: (b, 0, 0)),
                pl.BlockSpec((1, attr_c, HW), lambda b: (b, 0, 0)),
                pl.BlockSpec((1, c_x, 1), lambda b: (b, 0, 0)),
                pl.BlockSpec((1, c_x, 1), lambda b: (b, 0, 0)),
                pl.BlockSpec((2 * c_x, attr_c), lambda b: (0, 0)),
                pl.BlockSpec((2 * c_x, 1), lambda b: (0, 0)),
                wh_spec,
                pl.BlockSpec((1, 1), lambda b: (0, 0)),
            ],
            out_specs=pl.BlockSpec((1, c_x, HW), lambda b: (b, 0, 0)),
            compiler_params=pltpu.CompilerParams(
                dimension_semantics=("parallel",),
                vmem_limit_bytes=vmem_limit),
            cost_estimate=cost,
        )(h3, za3, gamma_id, beta_id, w_attr, b_attr, wh_arg, bh_sc)
        return out3.reshape(N, c_x, H, W)

    # ---- Tiled fallback: wrapper-side moments, HW tiled (padded to a
    # multiple of the lane tile so odd spatial sizes never force a whole-HW
    # resident block).
    # Moments: single f32-accumulated pass over the same act_dtype-rounded
    # values the kernel normalizes (two-pass here would cost a third full HBM
    # sweep over h, defeating the purpose of this fallback).
    h32 = h3.astype(f32)
    mean = jnp.mean(h32, axis=2, keepdims=True)                          # (N, c_x, 1)
    var = jnp.maximum(jnp.mean(h32 * h32, axis=2, keepdims=True) - mean * mean, 0.0)
    inv_std = lax.rsqrt(var + 1e-5)

    # Largest lane tile (multiple of 128) that fits the per-step VMEM budget.
    per_lane = (2 * (c_x + attr_c) * act_bytes + 2 * c_x * out_bytes
                + 2 * c_x * 4 + 2 * c_x * 4 + (2 * c_x + 2) * cd_bytes)
    fixed = 2 * 2 * c_x * attr_c * act_bytes + 6 * c_x * 4
    thw = max(128, (budget - fixed) // per_lane // 128 * 128)
    if max_hw_tile is not None:
        thw = min(thw, max_hw_tile)
    thw = min(thw, pl.cdiv(HW, 128) * 128)
    hw_pad = pl.cdiv(HW, thw) * thw
    if hw_pad != HW:
        pad = ((0, 0), (0, 0), (0, hw_pad - HW))
        h3 = jnp.pad(h3, pad)
        za3 = jnp.pad(za3, pad)

    kernel = partial(aad_tiled_kernel, use_mxu_conv_h=use_mxu_conv_h,
                     compute_dtype=compute_dtype)
    out3 = pl.pallas_call(
        kernel,
        out_shape=jax.ShapeDtypeStruct((N, c_x, hw_pad), out_dtype),
        grid=(N, hw_pad // thw),
        in_specs=[
            pl.BlockSpec((1, c_x, thw), lambda b, t: (b, 0, t)),
            pl.BlockSpec((1, attr_c, thw), lambda b, t: (b, 0, t)),
            pl.BlockSpec((1, c_x, 1), lambda b, t: (b, 0, 0)),
            pl.BlockSpec((1, c_x, 1), lambda b, t: (b, 0, 0)),
            pl.BlockSpec((1, c_x, 1), lambda b, t: (b, 0, 0)),
            pl.BlockSpec((1, c_x, 1), lambda b, t: (b, 0, 0)),
            pl.BlockSpec((2 * c_x, attr_c), lambda b, t: (0, 0)),
            pl.BlockSpec((2 * c_x, 1), lambda b, t: (0, 0)),
            wh_spec,
            pl.BlockSpec((1, 1), lambda b, t: (0, 0)),
        ],
        out_specs=pl.BlockSpec((1, c_x, thw), lambda b, t: (b, 0, t)),
        compiler_params=pltpu.CompilerParams(
            dimension_semantics=("parallel", "parallel"),
            vmem_limit_bytes=vmem_limit),
        cost_estimate=cost,
    )(h3, za3, mean, inv_std, gamma_id, beta_id, w_attr, b_attr, wh_arg, bh_sc)
    return out3[:, :, :HW].reshape(N, c_x, H, W)


# ---------------------------------------------------------------------------
# Pure-JAX reference (mirrors the PyTorch module)
# ---------------------------------------------------------------------------

def aad_layer_ref(h_in, z_attr, z_id, params):
    w1, b1, w2, b2, wf1, bf1, wf2, bf2, wh, bh = params
    mean = jnp.mean(h_in, axis=(2, 3), keepdims=True)
    var = jnp.mean(jnp.square(h_in - mean), axis=(2, 3), keepdims=True)
    h = (h_in - mean) / jnp.sqrt(var + 1e-5)
    gamma_attr = jnp.einsum('nchw,cd->ndhw', z_attr, w1) + b1.reshape(1, -1, 1, 1)
    beta_attr = jnp.einsum('nchw,cd->ndhw', z_attr, w2) + b2.reshape(1, -1, 1, 1)
    gamma_id = (z_id @ wf1 + bf1).reshape(h.shape[0], -1, 1, 1)
    beta_id = (z_id @ wf2 + bf2).reshape(h.shape[0], -1, 1, 1)
    A = gamma_attr * h + beta_attr
    I = gamma_id * h + beta_id
    M = jax.nn.sigmoid(jnp.einsum('nchw,cd->ndhw', h, wh) + bh.reshape(1, -1, 1, 1))
    return (1.0 - M) * A + M * I


# ---------------------------------------------------------------------------
# Self-test
# ---------------------------------------------------------------------------

if __name__ == "__main__":
    def make_inputs(key, N, c_x, attr_c, c_id, H, W, scale):
        ks = jax.random.split(key, 13)
        h_in = jax.random.normal(ks[0], (N, c_x, H, W), jnp.float32)
        z_attr = jax.random.normal(ks[1], (N, attr_c, H, W), jnp.float32)
        z_id = jax.random.normal(ks[2], (N, c_id), jnp.float32)
        params = (
            scale * jax.random.normal(ks[3], (attr_c, c_x), jnp.float32),   # conv1 w
            scale * jax.random.normal(ks[4], (1, c_x), jnp.float32),        # conv1 b
            scale * jax.random.normal(ks[5], (attr_c, c_x), jnp.float32),   # conv2 w
            scale * jax.random.normal(ks[6], (1, c_x), jnp.float32),        # conv2 b
            scale * jax.random.normal(ks[7], (c_id, c_x), jnp.float32),     # fc1 w
            scale * jax.random.normal(ks[8], (1, c_x), jnp.float32),        # fc1 b
            scale * jax.random.normal(ks[9], (c_id, c_x), jnp.float32),     # fc2 w
            scale * jax.random.normal(ks[10], (1, c_x), jnp.float32),       # fc2 b
            scale * jax.random.normal(ks[11], (c_x, 1), jnp.float32),       # conv_h w
            scale * jax.random.normal(ks[12], (1, 1), jnp.float32),         # conv_h b
        )
        return h_in, z_attr, z_id, params

    k1, k2 = jax.random.split(jax.random.PRNGKey(0))

    # ---- Config A: small channels -> fused single-HBM-pass path, VPU conv_h.
    h_in, z_attr, z_id, params = make_inputs(k1, 2, 8, 4, 32, 16, 16, scale=0.1)
    ref = aad_layer_ref(h_in, z_attr, z_id, params)

    # A1: pure-f32 path (what v5e would use for the elementwise chain) — tight check.
    out = aad_layer_pallas(h_in, z_attr, z_id, params,
                           act_dtype=jnp.float32, compute_dtype=jnp.float32)
    out = jax.block_until_ready(out)
    assert out.shape == (2, 8, 16, 16)
    assert jnp.allclose(out, ref, atol=2e-4, rtol=2e-4), "f32 fused path mismatch"

    # A2: default bf16-at-HBM / bf16 elementwise path (v6e/v7x) — bf16 tolerance.
    out = aad_layer_pallas(h_in, z_attr, z_id, params)
    out = jax.block_until_ready(out)
    assert jnp.allclose(out, ref, atol=8e-2, rtol=8e-2), "bf16 fused path mismatch"

    # ---- Config B: larger channels, forced tiled fallback with a padded
    # (non-128-multiple) HW, MXU conv_h, bf16 output store.
    h_in, z_attr, z_id, params = make_inputs(k2, 1, 128, 64, 32, 12, 12, scale=0.05)
    ref = aad_layer_ref(h_in, z_attr, z_id, params)
    out = aad_layer_pallas(h_in, z_attr, z_id, params, out_dtype=jnp.bfloat16,
                           force_tiled=True, max_hw_tile=128)
    out = jax.block_until_ready(out)
    assert out.shape == ref.shape
    assert jnp.allclose(out.astype(jnp.float32), ref, atol=1e-1, rtol=1e-1), \
        "bf16 tiled path mismatch"

    print("KERNEL_OK")
</pallas_src>

<mosaic_0001>
module attributes {stable_mosaic.version = 11 : i64} {
  func.func @aad_fused_kernel(%arg0: i32, %arg1: memref<1x8x256xf32, #tpu.memory_space<vmem>>, %arg2: memref<1x4x256xf32, #tpu.memory_space<vmem>>, %arg3: memref<1x8x1xf32, #tpu.memory_space<vmem>>, %arg4: memref<1x8x1xf32, #tpu.memory_space<vmem>>, %arg5: memref<16x4xf32, #tpu.memory_space<vmem>>, %arg6: memref<16x1xf32, #tpu.memory_space<vmem>>, %arg7: memref<8x1xf32, #tpu.memory_space<vmem>>, %arg8: memref<1x1xf32, #tpu.memory_space<vmem>>, %arg9: memref<1x8x256xf32, #tpu.memory_space<vmem>>) attributes {dimension_semantics = [#tpu.dimension_semantics<parallel>], iteration_bounds = array<i64: 2>, scalar_prefetch = 0 : i64, scratch_operands = 0 : i64, tpu.core_type = #tpu.core_type<tc>, window_params = [{transform_indices = @transform_0, window_bounds = array<i64: 1, 8, 256>}, {transform_indices = @transform_1, window_bounds = array<i64: 1, 4, 256>}, {transform_indices = @transform_2, window_bounds = array<i64: 1, 8, 1>}, {transform_indices = @transform_3, window_bounds = array<i64: 1, 8, 1>}, {pipeline_mode = #tpu.pipeline_mode<synchronous>, transform_indices = @transform_4, window_bounds = array<i64: 16, 4>}, {pipeline_mode = #tpu.pipeline_mode<synchronous>, transform_indices = @transform_5, window_bounds = array<i64: 16, 1>}, {pipeline_mode = #tpu.pipeline_mode<synchronous>, transform_indices = @transform_6, window_bounds = array<i64: 8, 1>}, {pipeline_mode = #tpu.pipeline_mode<synchronous>, transform_indices = @transform_7, window_bounds = array<i64: 1, 1>}, {transform_indices = @transform_8, window_bounds = array<i64: 1, 8, 256>}]} {
    %c0 = arith.constant 0 : index
    %c0_0 = arith.constant 0 : index
    %c0_1 = arith.constant 0 : index
    %0 = vector.load %arg1[%c0, %c0_0, %c0_1] : memref<1x8x256xf32, #tpu.memory_space<vmem>>, vector<1x8x256xf32>
    %1 = vector.shape_cast %0 : vector<1x8x256xf32> to vector<8x256xf32>
    %cst = arith.constant dense<0.000000e+00> : vector<8xf32>
    %2 = vector.multi_reduction <add>, %1, %cst [1] : vector<8x256xf32> to vector<8xf32>
    %3 = vector.shape_cast %2 : vector<8xf32> to vector<8x1xf32>
    %cst_2 = arith.constant 2.560000e+02 : f32
    %4 = vector.broadcast %cst_2 : f32 to vector<8x1xf32>
    %5 = arith.divf %3, %4 : vector<8x1xf32>
    %6 = vector.broadcast %5 : vector<8x1xf32> to vector<8x256xf32>
    %7 = arith.subf %1, %6 : vector<8x256xf32>
    %8 = arith.mulf %7, %7 : vector<8x256xf32>
    %cst_3 = arith.constant dense<0.000000e+00> : vector<8xf32>
    %9 = vector.multi_reduction <add>, %8, %cst_3 [1] : vector<8x256xf32> to vector<8xf32>
    %10 = vector.shape_cast %9 : vector<8xf32> to vector<8x1xf32>
    %cst_4 = arith.constant 2.560000e+02 : f32
    %11 = vector.broadcast %cst_4 : f32 to vector<8x1xf32>
    %12 = arith.divf %10, %11 : vector<8x1xf32>
    %cst_5 = arith.constant 9.99999974E-6 : f32
    %13 = vector.broadcast %cst_5 : f32 to vector<8x1xf32>
    %14 = arith.addf %12, %13 : vector<8x1xf32>
    %15 = math.rsqrt %14 : vector<8x1xf32>
    %16 = vector.broadcast %15 : vector<8x1xf32> to vector<8x256xf32>
    %17 = arith.mulf %7, %16 : vector<8x256xf32>
    %c0_6 = arith.constant 0 : index
    %c0_7 = arith.constant 0 : index
    %c0_8 = arith.constant 0 : index
    %18 = vector.load %arg2[%c0_6, %c0_7, %c0_8] : memref<1x4x256xf32, #tpu.memory_space<vmem>>, vector<1x4x256xf32>
    %19 = vector.shape_cast %18 : vector<1x4x256xf32> to vector<4x256xf32>
    %c0_9 = arith.constant 0 : index
    %c0_10 = arith.constant 0 : index
    %c0_11 = arith.constant 0 : index
    %20 = vector.load %arg3[%c0_9, %c0_10, %c0_11] : memref<1x8x1xf32, #tpu.memory_space<vmem>>, vector<1x8x1xf32>
    %21 = vector.shape_cast %20 : vector<1x8x1xf32> to vector<8x1xf32>
    %c0_12 = arith.constant 0 : index
    %c0_13 = arith.constant 0 : index
    %c0_14 = arith.constant 0 : index
    %22 = vector.load %arg4[%c0_12, %c0_13, %c0_14] : memref<1x8x1xf32, #tpu.memory_space<vmem>>, vector<1x8x1xf32>
    %23 = vector.shape_cast %22 : vector<1x8x1xf32> to vector<8x1xf32>
    %c0_15 = arith.constant 0 : index
    %c0_16 = arith.constant 0 : index
    %24 = vector.load %arg5[%c0_15, %c0_16] : memref<16x4xf32, #tpu.memory_space<vmem>>, vector<16x4xf32>
    %c0_17 = arith.constant 0 : index
    %c0_18 = arith.constant 0 : index
    %25 = vector.load %arg6[%c0_17, %c0_18] : memref<16x1xf32, #tpu.memory_space<vmem>>, vector<16x1xf32>
    %c0_19 = arith.constant 0 : index
    %c0_20 = arith.constant 0 : index
    %26 = vector.load %arg7[%c0_19, %c0_20] : memref<8x1xf32, #tpu.memory_space<vmem>>, vector<8x1xf32>
    %c0_21 = arith.constant 0 : index
    %c0_22 = arith.constant 0 : index
    %27 = vector.load %arg8[%c0_21, %c0_22] : memref<1x1xf32, #tpu.memory_space<vmem>>, vector<1x1xf32>
    %cst_23 = arith.constant dense<0.000000e+00> : vector<16x256xf32>
    %28 = tpu.matmul %24, %19, %cst_23 {dimension_numbers = #tpu.dot_dimension_numbers<[1], [0], [0], [1], [0, 0, 1, 1], [], []>} : vector<16x4xf32>, vector<4x256xf32>, vector<16x256xf32> -> vector<16x256xf32>
    %29 = vector.broadcast %25 : vector<16x1xf32> to vector<16x256xf32>
    %30 = arith.addf %28, %29 : vector<16x256xf32>
    %31 = vector.extract_strided_slice %30 {offsets = [0, 0], sizes = [8, 256], strides = [1, 1]} : vector<16x256xf32> to vector<8x256xf32>
    %32 = vector.extract_strided_slice %30 {offsets = [8, 0], sizes = [8, 256], strides = [1, 1]} : vector<16x256xf32> to vector<8x256xf32>
    %33 = arith.mulf %31, %17 : vector<8x256xf32>
    %34 = arith.addf %33, %32 : vector<8x256xf32>
    %35 = vector.broadcast %21 : vector<8x1xf32> to vector<8x256xf32>
    %36 = arith.mulf %35, %17 : vector<8x256xf32>
    %37 = vector.broadcast %23 : vector<8x1xf32> to vector<8x256xf32>
    %38 = arith.addf %36, %37 : vector<8x256xf32>
    %39 = vector.broadcast %26 : vector<8x1xf32> to vector<8x256xf32>
    %40 = arith.mulf %17, %39 : vector<8x256xf32>
    %cst_24 = arith.constant dense<0.000000e+00> : vector<256xf32>
    %41 = vector.multi_reduction <add>, %40, %cst_24 [0] : vector<8x256xf32> to vector<256xf32>
    %42 = vector.shape_cast %41 : vector<256xf32> to vector<1x256xf32>
    %43 = vector.broadcast %27 : vector<1x1xf32> to vector<1x256xf32>
    %44 = arith.addf %42, %43 : vector<1x256xf32>
    %45 = arith.negf %44 : vector<1x256xf32>
    %46 = math.exp %45 : vector<1x256xf32>
    %cst_25 = arith.constant 1.000000e+00 : f32
    %47 = vector.broadcast %cst_25 : f32 to vector<1x256xf32>
    %48 = arith.addf %47, %46 : vector<1x256xf32>
    %49 = arith.divf %47, %48 : vector<1x256xf32>
    %50 = arith.subf %38, %34 : vector<8x256xf32>
    %51 = vector.broadcast %49 : vector<1x256xf32> to vector<8x256xf32>
    %52 = arith.mulf %51, %50 : vector<8x256xf32>
    %53 = arith.addf %34, %52 : vector<8x256xf32>
    %c0_26 = arith.constant 0 : index
    %c0_27 = arith.constant 0 : index
    %c0_28 = arith.constant 0 : index
    %54 = vector.load %arg9[%c0_26, %c0_27, %c0_28] : memref<1x8x256xf32, #tpu.memory_space<vmem>>, vector<1x8x256xf32>
    %55 = vector.shape_cast %54 : vector<1x8x256xf32> to vector<8x256xf32>
    %56 = vector.shape_cast %53 : vector<8x256xf32> to vector<1x8x256xf32>
    tpu.vector_store %arg9[%c0_26, %c0_27, %c0_28], %56 {strides = array<i32>} : memref<1x8x256xf32, #tpu.memory_space<vmem>>, vector<1x8x256xf32>,
    return
  }
  func.func @transform_0(%arg0: i32) -> (i32, i32, i32) {
    %c0_i32 = arith.constant 0 : i32
    %c0_i32_0 = arith.constant 0 : i32
    %c0_i32_1 = arith.constant 0 : i32
    return %arg0, %c0_i32, %c0_i32_0 : i32, i32, i32
  }
  func.func @transform_1(%arg0: i32) -> (i32, i32, i32) {
    %c0_i32 = arith.constant 0 : i32
    %c0_i32_0 = arith.constant 0 : i32
    %c0_i32_1 = arith.constant 0 : i32
    return %arg0, %c0_i32, %c0_i32_0 : i32, i32, i32
  }
  func.func @transform_2(%arg0: i32) -> (i32, i32, i32) {
    %c0_i32 = arith.constant 0 : i32
    %c0_i32_0 = arith.constant 0 : i32
    %c0_i32_1 = arith.constant 0 : i32
    return %arg0, %c0_i32, %c0_i32_0 : i32, i32, i32
  }
  func.func @transform_3(%arg0: i32) -> (i32, i32, i32) {
    %c0_i32 = arith.constant 0 : i32
    %c0_i32_0 = arith.constant 0 : i32
    %c0_i32_1 = arith.constant 0 : i32
    return %arg0, %c0_i32, %c0_i32_0 : i32, i32, i32
  }
  func.func @transform_4(%arg0: i32) -> (i32, i32) {
    %c0_i32 = arith.constant 0 : i32
    %c0_i32_0 = arith.constant 0 : i32
    %c0_i32_1 = arith.constant 0 : i32
    return %c0_i32, %c0_i32_0 : i32, i32
  }
  func.func @transform_5(%arg0: i32) -> (i32, i32) {
    %c0_i32 = arith.constant 0 : i32
    %c0_i32_0 = arith.constant 0 : i32
    %c0_i32_1 = arith.constant 0 : i32
    return %c0_i32, %c0_i32_0 : i32, i32
  }
  func.func @transform_6(%arg0: i32) -> (i32, i32) {
    %c0_i32 = arith.constant 0 : i32
    %c0_i32_0 = arith.constant 0 : i32
    %c0_i32_1 = arith.constant 0 : i32
    return %c0_i32, %c0_i32_0 : i32, i32
  }
  func.func @transform_7(%arg0: i32) -> (i32, i32) {
    %c0_i32 = arith.constant 0 : i32
    %c0_i32_0 = arith.constant 0 : i32
    %c0_i32_1 = arith.constant 0 : i32
    return %c0_i32, %c0_i32_0 : i32, i32
  }
  func.func @transform_8(%arg0: i32) -> (i32, i32, i32) {
    %c0_i32 = arith.constant 0 : i32
    %c0_i32_0 = arith.constant 0 : i32
    %c0_i32_1 = arith.constant 0 : i32
    return %arg0, %c0_i32, %c0_i32_0 : i32, i32, i32
  }
}

</mosaic_0001>

<bundles_post_ra>
// kernel: tpu_custom_call.1
= control target key start
LH: loop header
LB: loop body
LE: loop exit
PB: predicated region body
PF: predicated region fallthrough
CT: control target
= control target key end

     0   :  { %s995_s0 = inlined_call_operand.vmem [shape: f32[2,8,256], index: 0, kind: input, shape index: {}]   ;;  %s996_s1 = inlined_call_operand.vmem [shape: f32[2,4,256], index: 1, kind: input, shape index: {}]   ;;  %s997_s2 = inlined_call_operand.vmem [shape: f32[2,8,1], index: 2, kind: input, shape index: {}]   ;;  %s998_s3 = inlined_call_operand.vmem [shape: f32[2,8,1], index: 3, kind: input, shape index: {}]   ;;  %s999_s4 = inlined_call_operand.vmem [shape: f32[16,4], index: 4, kind: input, shape index: {}]   ;;  %s1000_s5 = inlined_call_operand.vmem [shape: f32[16,1], index: 5, kind: input, shape index: {}]   ;;  %s1001_s6 = inlined_call_operand.vmem [shape: f32[8,1], index: 6, kind: input, shape index: {}]   ;;  %s1002_s7 = inlined_call_operand.<no memory space> [shape: f32[1,1], index: 7, kind: input, shape index: {}]   ;;  %s1003_s8 = inlined_call_operand.hbm [shape: f32[2,8,256], index: 8, kind: output, shape index: {}]  }
   0x1   :  { %v13_v0 = vstv %s1002_s7 }
   0x2   :  { %14 = vst [vmem:[#allocation2] sm:$0x1] %v13_v0 }
   0x3   :  { %15 = vsyncpa [#allocation4], 0 }
   0x4   :  { %17 = vsyncpa [#allocation4 + $0x1], 0  ;;  %s877_s29 = smov 0   ;;  %s879_s30 = smov 0  }
   0x5   :  { %s881_s9 = smov 0   ;;  %s883_s10 = smov 0  }
   0x6 LB: > { %s898_s7 = sadd.s32 4294967295, %s825_s10   ;;  %s678_s11 = sadd.s32 4294967294, %s825_s10   ;;  %s825_s10 = sphi %s883_s10, %s1009_s10   ;;  %s821_s9 = sphi %s881_s9, %s1008_s9   ;;  %s817_s30 = sphi %s879_s30, %s1007_s30   ;;  %s813_s29 = sphi %s877_s29, %s1006_s29  }
   0x7   : > { %s902_s12 = sadd.s32 1, %s825_s10   ;;  %s218_s13 = sadd.s32 1, %s821_s9 }
   0x8   : > { %s215_s14 = ssub.s32 %s825_s10, %s902_s12  ;;  %p228_p0 = scmp.ne.s32.totalorder %s821_s9, %s817_s30 }
   0x9   : > { %p216_p1 = scmp.eq.s32.totalorder %s215_s14, 0  ;;  %p229_p2 = scmp.eq.s32.totalorder %s898_s7, 1 }
   0xa   : > { %p234_p3 = scmp.ne.s32.totalorder %s817_s30, %s813_s29  ;;  %p235_p4 = scmp.eq.s32.totalorder %s678_s11, 1 }
   0xb   : > { %s913_s15 = scalar_select %p216_p1, %s821_s9, %s218_s13  }
   0xc   : > { %p915_p5 = por %p229_p2, %p228_p0  ;;  %p919_p6 = por %p235_p4, %p234_p3 }
   0xd   : > { %p681_p7 = scmp.ge.s32.totalorder %s825_s10, 1  ;;  %p295_p8 = scmp.lt.s32.totalorder %s825_s10, 3 }
   0xf   : > { %p296_p9 = pnand %p681_p7, %p295_p8 }
  0x10   : > { %p342_p10 = scmp.lt.s32.totalorder (!%p296_p9), %s898_s7, 1  ;;  %s704_s14 = sshll.u32 (!%p296_p9), %s898_s7, 4 }
  0x11   : > { %299 = sbr.rel (%p296_p9) target bundleno = 345 (0x159), region = 52  ;;  %s578_s21 = scalar_lea.hbm (!%p296_p9), %s1003_s8, %s704_s14 }
  0x16   : > { %s343_s18 = scalar_select %p342_p10, %s898_s7, 1  ;;  %v827_v5 = vmov 256.0   ;;  %vm424_vm0 = vcmask 1043456   ;;  %v398_v7 = vld [vmem:[%s999_s4 + $0x8] sm:$0xff]  ;;  %v828_v9 = vmov 0   ;;  %vm417_vm1 = vcmask 31744  }
  0x17   : > { %751 = vrcp.f32 %v827_v5  ;;  %748 = vset.pattern.permute.xlu1 %v828_v9  ;;  %v401_v10 = vld [vmem:[%s1001_s6] sm:$0xff]  ;;  %750 = vset.pattern.permute.xlu0 %v828_v9  ;;  %v402_v14 = vld [vmem:[#allocation2] sm:$0x1] }
  0x18   : > { %s702_s19 = sshll.u32 %s343_s18, 4  ;;  %s927_s20 = sshll.u32 %s343_s18, 3  ;;  %v397_v12 = vld [vmem:[%s999_s4] sm:$0xff]  ;;  %495 = vperm.xlu1 %748, %v401_v10   ;;  %749 = vset.pattern.permute.xlu2 %v828_v9  ;;  %v400_v25 = vld [vmem:[%s1000_s5 + $0x8] sm:$0xff] }
  0x19   : > { %s346_s23 = scalar_lea.vmem %s995_s0, %s702_s19  ;;  %s351_s26 = scalar_lea.vmem %s996_s1, %s927_s20  ;;  %v399_v19 = vld [vmem:[%s1000_s5] sm:$0xff] }
  0x1a   : > { %v360_v1 = vld [vmem:[%s346_s23] sm:$0xff]  ;;  %v361_v2 = vld [vmem:[%s346_s23 + $0x8] sm:$0xff]  ;;  %s359_s22 = scalar_lea.vmem %s998_s3, %s927_s20  ;;  %405 = vperm.xlu2 %749, %v399_v19   ;;  %s355_s11 = scalar_lea.vmem %s997_s2, %s927_s20 }
  0x1b   : > { %v394_v3 = vld [vmem:[%s351_s26] sm:$0xff]  ;;  %v362_v4 = vadd.f32 %v361_v2, %v360_v1  ;;  %s339_s20 = sand.u32 1, %s817_s30   ;;  %s582_s23 = sshll.u32 %s578_s21, 4  ;;  %s583_s23 = int_to_ptr.hbm [resolvable:$true] %s582_s23 }
  0x1c   : > { %414 = vst [vmem:[#allocation1] ss:$2 sm:$0xff] %v394_v3  ;;  %v396_v17 = vld [vmem:[%s359_s22] sm:$0xff]  ;;  %s682_s13 = sshll.u32 %s339_s20, 4  ;;  %s567_s24 = scalar_lea.sflag [#allocation4], %s339_s20 }
  0x1d   : > { %363 = vadd.xlane.f32.xlu0 %v362_v4  ;;  %v752_v11 = vpop.eup %751  ;;  %v395_v29 = vld [vmem:[%s355_s11] sm:$0xff]  ;;  %s341_s7 = scalar_lea.vmem [#allocation3], %s682_s13  ;;  %s777_s25 = sshra.s32 %s583_s23, 4  ;;  %s778_s25 = int_to_ptr.hbm [resolvable:$true] %s777_s25 }
  0x1e   : > { %v366_v13 = vmul.f32 256.0, %v752_v11  ;;  %vm370_vm2 = vweird.f32 %v752_v11  ;;  %s580_s22 = sshll.u32 %s341_s7, 4  ;;  %s779_s26 = scalar_lea.hbm %s778_s25, 16  ;;  %s581_s22 = int_to_ptr.vmem [resolvable:$true] %s580_s22 }
  0x1f   : > { %p780_p11 = scmp.ne.s32.totalorder %s778_s25, %s779_s26  ;;  %s783_s11 = scalar_lea.hbm %s1003_s8, 32 }
  0x20   : > { %v367_v15 = vsub.f32 1.0, %v366_v13  ;;  %514 = vperm.xlu1 %748, %v402_v14   ;;  %p784_p0 = scmp.lt.s32.totalorder %s778_s25, %s1003_s8  ;;  %p785_p1 = scmp.lt.s32.totalorder %s783_s11, %s779_s26 }
  0x21   : > { %p781_p12 = pnand %p780_p11, %p915_p5 }
  0x22   : > { %v368_v16 = vmul.f32 %v752_v11, %v367_v15  ;;  %410 = vperm.xlu2 %749, %v400_v25   ;;  %p786_p2 = por %p785_p1, %p784_p0 }
  0x23   : > { %v415_v6 = vld.sshfl [vmem:[#allocation1] sm:$0xff pattern:$0x75316420]  ;;  %v416_v8 = vld.sshfl [vmem:[#allocation1 + $0x8] sm:$0xff pattern:$0x75316420]  ;;  %p782_p13 = pneg %p781_p12 }
  0x24   : > { %705 = vmatpush.msk.msra.mxu2 %vm424_vm0, %v415_v6  ;;  %706 = vmatpush.msk.msra.mxu3 %vm424_vm0, %v416_v8  ;;  %v369_v18 = vadd.f32 %v752_v11, %v368_v16 }
  0x25   : > { %691 = vmatmul.msk.f32.vlgmr.msra.gmra.mxu2 %vm417_vm1, %v398_v7  ;;  %694 = vmatmul.msk.f32.vlgmr.msra.gmra.mxu3 %vm417_vm1, %v398_v7  ;;  %p787_p3 = pnand %p786_p2, %p782_p13 }
  0x26   : > { %689 = vmatpush.msk.msra.mxu0 %vm424_vm0, %v415_v6  ;;  %692 = vmatpush.msk.msra.mxu1 %vm424_vm0, %v416_v8  ;;  %v371_v20 = vsel %vm370_vm2, %v752_v11, %v369_v18 }
  0x27   : > { %690 = vmatmul.msk.f32.vlgmr.msra.gmra.mxu0 %vm417_vm1, %v397_v12  ;;  %693 = vmatmul.msk.f32.vlgmr.msra.gmra.mxu1 %vm417_vm1, %v397_v12 }
  0x28   : > { %488 = vperm.xlu1 %748, %v396_v17  }
  0x74   : > { %v406_v63 = vpop.permute.xlu2 %405 }
  0x7c   : > { %v411_v8 = vpop.permute.xlu2 %410 }
  0x8a   : > { %v496_v42 = vpop.permute.xlu1 %495 }
  0x90   : > { %v364_v21 = vpop.xlane.xlu0 %363 }
  0x91   : > { %v372_v22 = vmul.f32 %v371_v20, %v364_v21 }
  0x92   : > { %v515_v55 = vpop.permute.xlu1 %514 }
  0x93   : > { %v373_v23 = vsub.f32 %v360_v1, %v372_v22  ;;  %v374_v24 = vsub.f32 %v361_v2, %v372_v22  ;;  %v517_v58 = vperm.slane %v515_v55, 0 }
  0x95   : > { %v375_v26 = vmul.f32 %v373_v23, %v373_v23  ;;  %v376_v27 = vmul.f32 %v374_v24, %v374_v24 }
  0x97   : > { %v377_v28 = vadd.f32 %v376_v27, %v375_v26 }
  0x99   : > { %378 = vadd.xlane.f32.xlu0 %v377_v28 }
  0x9a   : > { %v489_v22 = vpop.permute.xlu1 %488 }
  0xa4   : > { %v446_v3 = vpop.f32.mrf.mxu0  ;;  %v469_v5 = vpop.f32.mrf.mxu1 }
  0xa5   : > { %v447_v6 = vadd.f32 %v446_v3, %v406_v63  ;;  %v470_v7 = vadd.f32 %v469_v5, %v406_v63 }
  0xa8   : > { %v449_v9 = vpop.f32.mrf.mxu2  ;;  %v472_v10 = vpop.f32.mrf.mxu3 }
  0xa9   : > { %v450_v13 = vadd.f32 %v449_v9, %v411_v8  ;;  %v473_v16 = vadd.f32 %v472_v10, %v411_v8 }
  0xad   : > { %481 = vperm.xlu0 %750, %v395_v29  }
 0x10c   : > { %v379_v30 = vpop.xlane.xlu0 %378 }
 0x10d   : > { %v380_v31 = vmul.f32 %v379_v30, %v371_v20 }
 0x10f   : > { %v381_v32 = vadd.f32 1e-05, %v380_v31 }
 0x111   : > { %753 = vrsqrt.f32 %v381_v32  ;;  %vm388_vm4 = vweird.f32 %v381_v32 }
 0x117   : > { %v754_v33 = vpop.eup %753 }
 0x118   : > { %v383_v34 = vmul.f32 %v754_v33, %v381_v32  ;;  %vm389_vm3 = vweird.f32 %v754_v33 }
 0x119   : > { %vm390_vm5 = vmor %vm388_vm4, %vm389_vm3 }
 0x11a   : > { %v384_v35 = vmul.f32 %v754_v33, %v383_v34 }
 0x11c   : > { %v385_v36 = vmul.f32 0.5, %v384_v35 }
 0x11e   : > { %v386_v37 = vsub.f32 1.5, %v385_v36 }
 0x11f   : > { %v482_v11 = vpop.permute.xlu0 %481 }
 0x120   : > { %v387_v38 = vmul.f32 %v754_v33, %v386_v37 }
 0x122   : > { %v391_v39 = vsel %vm390_vm5, %v754_v33, %v387_v38 }
 0x123   : > { %v392_v40 = vmul.f32 %v391_v39, %v373_v23  ;;  %v393_v41 = vmul.f32 %v391_v39, %v374_v24 }
 0x125   : > { %v498_v43 = vmul.f32 %v496_v42, %v392_v40  ;;  %v499_v44 = vmul.f32 %v496_v42, %v393_v41  ;;  %v475_v12 = vmul.f32 %v447_v6, %v392_v40  ;;  %v476_v15 = vmul.f32 %v470_v7, %v393_v41 }
 0x126   : > { %v484_v17 = vmul.f32 %v482_v11, %v392_v40  ;;  %v485_v21 = vmul.f32 %v482_v11, %v393_v41 }
 0x127   : > { %v500_v45 = vrot.slane %v498_v43, 4  ;;  %v506_v46 = vrot.slane %v499_v44, 4  ;;  %v477_v23 = vadd.f32 %v475_v12, %v450_v13  ;;  %v478_v25 = vadd.f32 %v476_v15, %v473_v16 }
 0x128   : > { %v491_v28 = vadd.f32 %v489_v22, %v484_v17  ;;  %v492_v34 = vadd.f32 %v489_v22, %v485_v21 }
 0x129   : > { %v501_v47 = vadd.f32 %v500_v45, %v498_v43  ;;  %v507_v48 = vadd.f32 %v506_v46, %v499_v44 }
 0x12a   : > { %v558_v40 = vsub.f32 %v491_v28, %v477_v23  ;;  %v559_v43 = vsub.f32 %v492_v34, %v478_v25 }
 0x12b   : > { %v502_v49 = vrot.slane %v501_v47, 2  ;;  %v508_v50 = vrot.slane %v507_v48, 2 }
 0x12d   : > { %v503_v51 = vadd.f32 %v502_v49, %v501_v47  ;;  %v509_v52 = vadd.f32 %v508_v50, %v507_v48 }
 0x12f   : > { %v504_v53 = vrot.slane %v503_v51, 1  ;;  %v510_v54 = vrot.slane %v509_v52, 1 }
 0x131   : > { %v505_v56 = vadd.f32 %v504_v53, %v503_v51  ;;  %v511_v57 = vadd.f32 %v510_v54, %v509_v52 }
 0x133   : > { %v518_v59 = vadd.f32 %v517_v58, %v505_v56  ;;  %v519_v60 = vadd.f32 %v517_v58, %v511_v57 }
 0x135   : > { %v695_v61 = vmul.f32 -1.442695, %v518_v59  ;;  %v696_v62 = vmul.f32 -1.442695, %v519_v60 }
 0x137   : > { %755 = vpow2.f32 %v695_v61 }
 0x138   : > { %757 = vpow2.f32 %v696_v62 }
 0x13d   : > { %v756_v0 = vpop.eup %755 }
 0x13e   : > { %v758_v1 = vpop.eup %757  ;;  %v526_v2 = vadd.f32 1.0, %v756_v0 }
 0x13f   : > { %v527_v4 = vadd.f32 1.0, %v758_v1 }
 0x140   : > { %759 = vrcp.f32 %v526_v2  ;;  %v539_v26 = vand.u32 2147483648, %v526_v2  ;;  %v537_v30 = vand.u32 2147483647, %v526_v2  ;;  %vm533_vm8 = vweird.f32 %v526_v2 }
 0x141   : > { %761 = vrcp.f32 %v527_v4  ;;  %v554_v31 = vand.u32 2147483648, %v527_v4  ;;  %v552_v33 = vand.u32 2147483647, %v527_v4  ;;  %vm548_vm10 = vweird.f32 %v527_v4 }
 0x142   : > { %v540_v36 = vor.u32 1.1754944e-38, %v539_v26  ;;  %vm538_vm11 = vcmp.eq.f32.partialorder %v537_v30, 8.507059e+37 }
 0x143   : > { %v555_v39 = vor.u32 1.1754944e-38, %v554_v31  ;;  %vm553_vm13 = vcmp.eq.f32.partialorder %v552_v33, 8.507059e+37 }
 0x146   : > { %v760_v14 = vpop.eup %759 }
 0x147   : > { %v762_v18 = vpop.eup %761  ;;  %v529_v19 = vmul.f32 %v760_v14, %v526_v2  ;;  %vm534_vm6 = vweird.f32 %v760_v14 }
 0x148   : > { %v544_v20 = vmul.f32 %v762_v18, %v527_v4  ;;  %vm549_vm7 = vweird.f32 %v762_v18  ;;  %vm535_vm9 = vmor %vm533_vm8, %vm534_vm6 }
 0x149   : > { %v530_v24 = vsub.f32 1.0, %v529_v19  ;;  %vm550_vm12 = vmor %vm548_vm10, %vm549_vm7 }
 0x14a   : > { %v545_v27 = vsub.f32 1.0, %v544_v20 }
 0x14b   : > { %v531_v29 = vmul.f32 %v760_v14, %v530_v24 }
 0x14c   : > { %v546_v32 = vmul.f32 %v762_v18, %v545_v27 }
 0x14d   : > { %v532_v35 = vadd.f32 %v760_v14, %v531_v29 }
 0x14e   : > { %v547_v37 = vadd.f32 %v762_v18, %v546_v32 }
 0x14f   : > { %v536_v38 = vsel %vm535_vm9, %v760_v14, %v532_v35 }
 0x150   : > { %v541_v41 = vsel %vm538_vm11, %v540_v36, %v536_v38  ;;  %v551_v42 = vsel %vm550_vm12, %v762_v18, %v547_v37 }
 0x151   : > { %v556_v44 = vsel %vm553_vm13, %v555_v39, %v551_v42  ;;  %v560_v45 = vmul.f32 %v558_v40, %v541_v41 }
 0x152   : > { %v561_v46 = vmul.f32 %v559_v43, %v556_v44 }
 0x153   : > { %v562_v47 = vadd.f32 %v560_v45, %v477_v23 }
 0x154   : > { %v563_v48 = vadd.f32 %v561_v46, %v478_v25 }
 0x155   : > { %564 = vst [vmem:[%s341_s7] sm:$0xff] %v562_v47 }
 0x156   : > { %565 = vst [vmem:[%s341_s7 + $0x8] sm:$0xff] %v563_v48 }
 0x157   : > { %790 = shalt.err (!%p787_p3)
}
 0x158   : > { %707 = dma.vmem_to_hbm [thread:$0]  (%p915_p5), %s581_s22, 256, %s583_s23, %s567_s24  }
 0x159 PF: > { %p713_p4 = scmp.ge.s32.totalorder %s825_s10, 2  ;;  %s594_s20 = sand.u32 1, %s813_s29  }
 0x15a   : > { %s595_s18 = scalar_lea.sflag [#allocation4], %s594_s20 }
 0x15b   : > { %p710_p7 = pnand %p713_p4, %p919_p6 }
 0x15d   : > { %p711_p8 = pneg %p710_p7 }
 0x15f   : > { %808 = dma.done.wait (%p711_p8), %s595_s18, 256  }
 0x160   : > { %810 = vsyncadd (%p711_p8), %s595_s18, 4294967040  ;;  %p20_p9 = scmp.ge.s32.totalorder %s902_s12, 4   ;;  %s1006_s29 = smov %s817_s30 }
 0x161   : > { %s1007_s30 = smov %s821_s9  ;;  %s1008_s9 = smov %s913_s15 }
 0x162   : > { %s1009_s10 = smov %s902_s12  ;;  %22 = sbr.rel (!%p20_p9) target bundleno = 6 (0x6), region = 96 }
 0x167   :  { %601 = vsyncpa [#allocation4], 1 }
 0x168   :  { %603 = vsyncpa [#allocation4 + $0x1], 1 }

</bundles_post_ra>
